<compile_context>
chip_gen: v5e
topology: v5e:2x2
jax: 0.10.0
libtpu: 0.0.40
codegen_flags: <defaults>
</compile_context>

<pallas_src>
import math

import jax
import jax.numpy as jnp
import numpy as np
from jax.experimental import pallas as pl
from jax.experimental.pallas import tpu as pltpu

TAU_MIN = 1e-4


# ------------------------- per-generation tile caps -------------------------

def _device_caps():
    """(matmul tile cap, conv chunk cap, vmem clamp) per TPU generation."""
    try:
        kind = jax.devices()[0].device_kind.lower()
    except Exception:
        kind = ""
    if "v5" in kind or "v6" in kind:
        # 128 MiB physical VMEM: bigger tiles amortize the ~0.35us/step overhead
        # and cut the number of weight/Toeplitz re-streams.
        return 1024, 1024, 112 * 2**20
    # v7x (64 MiB physical / 32 MiB scoped default) and unknown: conservative.
    return 512, 512, 56 * 2**20


def _vmem_limit(block_bytes, clamp):
    """Explicit scoped-VMEM request (2x for double buffering + slack)."""
    est = 2 * block_bytes + (2 << 20)
    if est <= (30 << 20):
        return None                      # default 32 MiB scoped limit is fine
    return int(min(clamp, est))


def _pick_tile(dim, cap, align):
    """Largest `align`-multiple tile <= cap that divides dim; else full dim."""
    if dim <= cap:
        return dim
    t = cap - (cap % align)
    while t >= align:
        if dim % t == 0:
            return t
        t -= align
    # TODO(synk): pad the array instead of falling back to the full dim (the
    # full-dim fallback can exceed scoped VMEM for huge, prime-ish dims).
    return dim


# ----------------------------- Pallas kernels ------------------------------

def matmul_kernel(x_ref, w_ref, o_ref):
    """One (tm, K) @ (K, tn) tile on the MXU, f32 accumulation."""
    o_ref[...] = jnp.dot(x_ref[...], w_ref[...],
                         preferred_element_type=jnp.float32).astype(o_ref.dtype)


def s4_chunk_kernel(xp_ref, m0_ref, coef_ref, y_ref, hr_ref, hi_ref):
    """One (mode, time-chunk) step of the chunked block-Toeplitz S4D conv.

    xp_ref   : (1, Bh, C)  mode-m inputs for this chunk (time on lanes)
    m0_ref   : (1, C, C)   lower-tri intra-chunk Toeplitz block of mode m
                           (M0[ds, dt] = K[dt - ds] for dt >= ds, else 0)
    coef_ref : (1, 8, C)   f32 per-mode coefficient table:
                 row 0:  g*r^(dt+1)*cos((dt+1)*th)   cross -> y (real)
                 row 1: -g*r^(dt+1)*sin((dt+1)*th)   cross -> y (imag)
                 row 2:  r^(C-1-ds)*cos((C-1-ds)*th) state injection (real)
                 row 3:  r^(C-1-ds)*sin((C-1-ds)*th) state injection (imag)
                 row 4:  r^C*cos(C*th)  (broadcast)  state decay (real)
                 row 5:  r^C*sin(C*th)  (broadcast)  state decay (imag)
    y_ref    : (1, Bh, C)  mode-m outputs for this chunk
    hr/hi    : (Bh, 1)     f32 VMEM scratch: complex cross-chunk state,
                           h_j = sum_{s < j*C} xp[s] * lambda^(j*C - 1 - s)
    """
    j = pl.program_id(1)

    @pl.when(j == 0)
    def _():
        hr_ref[...] = jnp.zeros_like(hr_ref)
        hi_ref[...] = jnp.zeros_like(hi_ref)

    xp = xp_ref[0]                                     # (Bh, C)
    coef = coef_ref[0]                                 # (8, C) f32
    hr = hr_ref[...]                                   # (Bh, 1) f32
    hi = hi_ref[...]

    # intra-chunk causal conv on the MXU (f32 accumulation)
    y = jnp.dot(xp, m0_ref[0], preferred_element_type=jnp.float32)   # (Bh, C)

    # strictly-causal cross-chunk contribution: exactly rank-2 per mode (VPU)
    #   y_cross[b, dt] = g * Re{ lambda^(dt+1) * h }   with h = hr + i*hi
    y += hr * coef[0:1, :] + hi * coef[1:2, :]
    y_ref[0] = y.astype(y_ref.dtype)

    # carry the complex state: h <- lambda^C * h + sum_ds xp[ds]*lambda^(C-1-ds)
    xpf = xp.astype(jnp.float32)
    inj_r = jnp.sum(xpf * coef[2:3, :], axis=-1, keepdims=True)       # (Bh, 1)
    inj_i = jnp.sum(xpf * coef[3:4, :], axis=-1, keepdims=True)
    pr = coef[4:5, 0:1]                                               # (1, 1)
    pi = coef[5:6, 0:1]
    hr_ref[...] = pr * hr - pi * hi + inj_r
    hi_ref[...] = pi * hr + pr * hi + inj_i


# ------------------------------ pallas wrappers ------------------------------

def tiled_matmul(x, w, out_dtype=jnp.float32, tm_cap=512, tn_cap=512,
                 vmem_clamp=56 * 2**20):
    """(M, K) @ (K, N) with a 2-D parallel grid and lane-dense output tiles.

    The grid order is chosen so the LARGER operand is the resident one (read
    once across the inner axis) and the smaller one is the one re-streamed.
    """
    M, K = x.shape
    K2, N = w.shape
    assert K == K2
    sub_align = 16 if x.dtype == jnp.bfloat16 else 8   # bf16 packs 2 rows/sublane
    tm = _pick_tile(M, tm_cap, sub_align)
    tn = _pick_tile(N, tn_cap, 128)
    gm, gn = M // tm, N // tn
    x_bytes = M * K * x.dtype.itemsize
    w_bytes = K * N * w.dtype.itemsize
    out_bytes = M * N * np.dtype(out_dtype).itemsize
    # Row-major grid iteration: the operand indexed only by the OUTER grid axis
    # is resident (read once); the other operand is re-read (outer extent) times.
    traffic_m_outer = x_bytes + gm * w_bytes           # grid (gm, gn): x resident
    traffic_n_outer = gn * x_bytes + w_bytes           # grid (gn, gm): w resident
    # TODO(synk): add a K grid axis + VMEM f32 accumulator (pl.when init/finalize,
    # K last and "arbitrary") once K grows past a few thousand.
    if traffic_m_outer <= traffic_n_outer:
        grid = (gm, gn)
        in_specs = [pl.BlockSpec((tm, K), lambda i, j: (i, 0)),
                    pl.BlockSpec((K, tn), lambda i, j: (0, j))]
        out_spec = pl.BlockSpec((tm, tn), lambda i, j: (i, j))
        bytes_accessed = traffic_m_outer + out_bytes
    else:
        grid = (gn, gm)
        in_specs = [pl.BlockSpec((tm, K), lambda j, i: (i, 0)),
                    pl.BlockSpec((K, tn), lambda j, i: (0, j))]
        out_spec = pl.BlockSpec((tm, tn), lambda j, i: (i, j))
        bytes_accessed = traffic_n_outer + out_bytes
    block_bytes = (tm * K * x.dtype.itemsize + K * tn * w.dtype.itemsize
                   + tm * tn * np.dtype(out_dtype).itemsize)
    return pl.pallas_call(
        matmul_kernel,
        out_shape=jax.ShapeDtypeStruct((M, N), out_dtype),
        grid=grid,
        in_specs=in_specs,
        out_specs=out_spec,
        compiler_params=pltpu.CompilerParams(
            dimension_semantics=("parallel", "parallel"),
            vmem_limit_bytes=_vmem_limit(block_bytes, vmem_clamp)),
        cost_estimate=pl.CostEstimate(flops=int(2 * M * N * K),
                                      transcendentals=0,
                                      bytes_accessed=int(bytes_accessed)),
    )(x, w)


def s4_causal_conv(xp_modes, m0_modes, coef_modes, out_dtype, chunk,
                   vmem_clamp=56 * 2**20):
    """Chunked block-Toeplitz causal conv: grid = (modes, time-chunks)."""
    Nh, Bh, S = xp_modes.shape
    assert S % chunk == 0
    grid = (Nh, S // chunk)
    block_bytes = (Bh * chunk * xp_modes.dtype.itemsize
                   + chunk * chunk * m0_modes.dtype.itemsize
                   + 8 * chunk * 4
                   + Bh * chunk * np.dtype(out_dtype).itemsize)
    flops = 2 * Nh * Bh * S * chunk + 8 * Nh * Bh * S
    bytes_accessed = int(xp_modes.size * xp_modes.dtype.itemsize
                         + m0_modes.size * m0_modes.dtype.itemsize
                         + coef_modes.size * coef_modes.dtype.itemsize
                         + Nh * Bh * S * np.dtype(out_dtype).itemsize)
    return pl.pallas_call(
        s4_chunk_kernel,
        out_shape=jax.ShapeDtypeStruct((Nh, Bh, S), out_dtype),
        grid=grid,
        in_specs=[pl.BlockSpec((1, Bh, chunk), lambda m, j: (m, 0, j)),
                  pl.BlockSpec((1, chunk, chunk), lambda m, j: (m, 0, 0)),
                  pl.BlockSpec((1, 8, chunk), lambda m, j: (m, 0, 0))],
        out_specs=pl.BlockSpec((1, Bh, chunk), lambda m, j: (m, 0, j)),
        scratch_shapes=[pltpu.VMEM((Bh, 1), jnp.float32),
                        pltpu.VMEM((Bh, 1), jnp.float32)],
        compiler_params=pltpu.CompilerParams(
            # mode axis megacore-parallel; time axis sequential (carries state)
            dimension_semantics=("parallel", "arbitrary"),
            vmem_limit_bytes=_vmem_limit(block_bytes, vmem_clamp)),
        cost_estimate=pl.CostEstimate(flops=int(flops), transcendentals=0,
                                      bytes_accessed=bytes_accessed),
    )(xp_modes, m0_modes, coef_modes)


# ----------------------------- parameter setup -----------------------------

def make_params(embed_dim, heads, key):
    d_k = embed_dim // heads
    assert d_k % 2 == 0
    N = d_k // 2                   # S4DFFT "N" (== N_modes of S4PreMix)
    assert N % 2 == 0
    Nh = N // 2
    kB, kC, kin, kout, kqkv = jax.random.split(key, 5)
    n = jnp.arange(Nh, dtype=jnp.float32)
    return dict(
        log_tau=jnp.full((Nh,), math.log(0.5), jnp.float32),
        freq=(math.pi * (2.0 * n + 1.0) / 2.0).astype(jnp.float32),   # hippoD
        B=1.0 + 0.2 * jax.random.normal(kB, (Nh,), jnp.float32),
        C=(1.0 / math.sqrt(N / 2)) * jax.random.normal(kC, (Nh,), jnp.float32),
        log_dt=jnp.zeros((), jnp.float32),
        # nn.Linear default init (uniform +-1/sqrt(fan_in)), weight is (out, in)
        w_in=jax.random.uniform(kin, (Nh, d_k), jnp.float32,
                                -1.0 / math.sqrt(d_k), 1.0 / math.sqrt(d_k)),
        w_out=jax.random.uniform(kout, (d_k, Nh), jnp.float32,
                                 -1.0 / math.sqrt(Nh), 1.0 / math.sqrt(Nh)),
        w_qkv=jax.random.uniform(kqkv, (3 * embed_dim, embed_dim), jnp.float32,
                                 -1.0 / math.sqrt(embed_dim),
                                 1.0 / math.sqrt(embed_dim)),
    )


def s4d_mode_params(params):
    """Per half-mode damped-cosine kernel params: K[i] = g * r^i * cos(i*th)."""
    dt = jnp.exp(params["log_dt"])
    tau = jnp.maximum(jnp.exp(params["log_tau"]), TAU_MIN)
    theta = params["freq"] * dt
    log_r = -tau * dt                                   # log|lambda|, < 0
    log_g = (jnp.log(jnp.abs(params["B"]) + 1e-9)
             + jnp.log(jnp.abs(params["C"]) + 1e-9))
    return log_r, theta, log_g


def s4d_kernel_table(params, T):
    """K_half (Nh, T), the real damped-cosine S4D kernel, computed in f32."""
    log_r, theta, log_g = s4d_mode_params(params)
    i = jnp.arange(T, dtype=jnp.float32)
    amp = jnp.exp(log_g[:, None] + i[None, :] * log_r[:, None])
    return amp * jnp.cos(i[None, :] * theta[:, None])


def s4d_chunk_tables(params, chunk):
    """Intra-chunk Toeplitz block (Nh, C, C) + cross-chunk coef table (Nh, 8, C)."""
    log_r, theta, log_g = s4d_mode_params(params)
    K_half = s4d_kernel_table(params, chunk)                          # (Nh, C)
    lag = jnp.arange(chunk)[None, :] - jnp.arange(chunk)[:, None]     # dt - ds
    m0 = jnp.where((lag >= 0)[None, :, :],
                   K_half[:, jnp.clip(lag, 0, chunk - 1)], 0.0)       # (Nh,C,C)

    g = jnp.exp(log_g)
    dtp1 = jnp.arange(1, chunk + 1, dtype=jnp.float32)                # dt + 1
    rp = jnp.exp(log_r[:, None] * dtp1[None, :])
    ycr = g[:, None] * rp * jnp.cos(theta[:, None] * dtp1[None, :])
    yci = -g[:, None] * rp * jnp.sin(theta[:, None] * dtp1[None, :])
    rev = jnp.arange(chunk - 1, -1, -1, dtype=jnp.float32)            # C-1-ds
    rr = jnp.exp(log_r[:, None] * rev[None, :])
    ucr = rr * jnp.cos(theta[:, None] * rev[None, :])
    uci = rr * jnp.sin(theta[:, None] * rev[None, :])
    c_f = jnp.float32(chunk)
    ones = jnp.ones((1, chunk), jnp.float32)
    pr = (jnp.exp(log_r * c_f) * jnp.cos(theta * c_f))[:, None] * ones
    pi = (jnp.exp(log_r * c_f) * jnp.sin(theta * c_f))[:, None] * ones
    zero = jnp.zeros_like(ycr)
    coef = jnp.stack([ycr, yci, ucr, uci, pr, pi, zero, zero], axis=1)
    return m0, coef                                                   # f32


def blockdiag_in_weight(params, heads, d_k, Nh):
    """Lane-dense in_proj weight: (E, heads*Nh) block-diagonal copy of w_in^T.

    (B*S, E) @ W_bd has the same flat element order as applying w_in^T per head
    to the raw (B*heads, S, d_k) view of x, so downstream reshapes/semantics
    are untouched, but the Pallas matmul output is heads*Nh lanes wide (dense
    vst) instead of Nh-wide masked stores.
    """
    w_in_t = params["w_in"].T                                         # (d_k, Nh)
    eye_h = jnp.eye(heads, dtype=w_in_t.dtype)
    return jnp.einsum("ij,cm->icjm", eye_h, w_in_t).reshape(heads * d_k,
                                                            heads * Nh)


def fused_out_qkv_weight(params, heads, d_k, Nh):
    """W_fused = blockdiag_heads(w_out^T) @ w_qkv^T  ->  (heads*Nh, 3E)."""
    w_out_t = params["w_out"].T                                       # (Nh, d_k)
    w_qkv_t = params["w_qkv"].T                                       # (E, 3E)
    three_e = w_qkv_t.shape[1]
    w_qkv_blocks = w_qkv_t.reshape(heads, d_k, three_e)
    fused = jnp.einsum("nd,hdo->hno", w_out_t, w_qkv_blocks)          # (h, Nh, 3E)
    return fused.reshape(heads * Nh, three_e)


# ------------------------------- forward pass ------------------------------

def s4_premix_forward(x, params, heads, compute_dtype=jnp.float32, chunk=None):
    B, S, E = x.shape
    d_k = E // heads
    Nh = (d_k // 2) // 2
    Bh = B * heads
    mm_cap, chunk_cap, vmem_clamp = _device_caps()

    if chunk is None:
        chunk = _pick_tile(S, chunk_cap, 128)
    assert S % chunk == 0 and (chunk == S or chunk % 128 == 0)

    # tiny per-mode tables: (Nh, chunk, chunk) Toeplitz block + (Nh, 8, chunk)
    # cross-chunk coefficients (the latter stay f32 for the state path)
    m0, coef = s4d_chunk_tables(params, chunk)
    m0 = m0.astype(compute_dtype)
    w_in_bd = blockdiag_in_weight(params, heads, d_k, Nh).astype(compute_dtype)
    w_fused = fused_out_qkv_weight(params, heads, d_k, Nh).astype(compute_dtype)

    # same memory reinterpretation as torch .view on a contiguous tensor
    x2d = x.reshape(B * S, E).astype(compute_dtype)

    # lane-dense in_proj over all (b, s) rows (flat order == per-head proj on
    # the raw (B*heads, S, d_k) view)
    xp = tiled_matmul(x2d, w_in_bd, out_dtype=compute_dtype,
                      tm_cap=mm_cap, tn_cap=mm_cap, vmem_clamp=vmem_clamp)

    # layout plumbing: modes-major, time on lanes (XLA relayout, compute dtype)
    # TODO(synk): fuse this transpose into the in_proj kernel (XLU is idle
    # there) to kill the extra HBM round trip of the activation.
    xp_modes = jnp.transpose(xp.reshape(Bh, S, Nh), (2, 0, 1))        # (Nh,Bh,S)

    # chunked block-Toeplitz causal conv (intra: MXU, cross-chunk: rank-2 state)
    y_modes = s4_causal_conv(xp_modes, m0, coef, compute_dtype, chunk,
                             vmem_clamp=vmem_clamp)

    # back to row-major (b, s, h, m); the raw (Bh,S,d_k)->(B,S,E) view is the
    # identity on d_k/Nh blocks in flat order, so the fused out_proj+qkv below
    # is exactly the original out_proj followed by the qkv linear.
    z2d = jnp.transpose(y_modes, (1, 2, 0)).reshape(B * S, heads * Nh)

    qkv = tiled_matmul(z2d, w_fused, out_dtype=jnp.float32,
                       tm_cap=mm_cap, tn_cap=mm_cap, vmem_clamp=vmem_clamp)
    qkv = qkv.reshape(B, S, 3 * E)
    q, k, v = jnp.split(qkv, 3, axis=-1)

    def to_heads(t):
        return t.reshape(B, S, heads, d_k).transpose(0, 2, 1, 3)

    return to_heads(q), to_heads(k), to_heads(v)


# ------------------------- pure-JAX reference (FFT) -------------------------

def _next_pow_two(n):
    return 1 << (int(n) - 1).bit_length()


def reference_forward(x, params, heads):
    B, S, E = x.shape
    d_k = E // heads
    N = d_k // 2
    Nh = N // 2
    Bh = B * heads
    xd = x.reshape(Bh, S, d_k)
    xp = xd @ params["w_in"].T                                        # (Bh,S,Nh)
    x_modes = jnp.concatenate([xp, xp[..., ::-1]], axis=-1)           # (Bh,S,N)
    L = _next_pow_two(2 * S)
    Uf = jnp.transpose(jnp.fft.rfft(x_modes, n=L, axis=1), (0, 2, 1))
    K_half = s4d_kernel_table(params, S)
    K_full = jnp.concatenate([K_half, K_half[::-1]], axis=0)          # (N, S)
    Kf = jnp.fft.rfft(K_full, n=L, axis=-1)
    Yf = Uf * Kf[None]
    y_modes = jnp.fft.irfft(Yf, n=L, axis=2)[..., :S]
    y_modes = jnp.transpose(y_modes, (0, 2, 1))                       # (Bh,S,N)
    y = y_modes[..., :Nh] @ params["w_out"].T                         # (Bh,S,d_k)
    x2 = y.reshape(B, S, E)
    qkv = x2 @ params["w_qkv"].T
    q, k, v = jnp.split(qkv, 3, axis=-1)

    def to_heads(t):
        return t.reshape(B, S, heads, d_k).transpose(0, 2, 1, 3)

    return to_heads(q), to_heads(k), to_heads(v)


# ----------------------------------- main -----------------------------------

if __name__ == "__main__":
    # --- small exactness check (single time chunk) ---
    B, S, E, heads = 2, 8, 32, 2          # d_k = 16, N = 8, Nh = 4
    kx, kp = jax.random.split(jax.random.PRNGKey(0))
    x = jax.random.normal(kx, (B, S, E), jnp.float32)
    params = make_params(E, heads, kp)

    q, k, v = s4_premix_forward(x, params, heads, compute_dtype=jnp.float32)
    jax.block_until_ready((q, k, v))
    qr, kr, vr = reference_forward(x, params, heads)
    for got, ref in ((q, qr), (k, kr), (v, vr)):
        np.testing.assert_allclose(np.asarray(got), np.asarray(ref),
                                   rtol=2e-3, atol=2e-3)
    assert q.shape == (B, heads, S, E // heads)

    # --- multi-chunk check: exercises the rank-2 cross-chunk state carry ---
    B2, S2 = 2, 256
    kx2, kp2 = jax.random.split(jax.random.PRNGKey(1))
    x2 = jax.random.normal(kx2, (B2, S2, E), jnp.float32)
    params2 = make_params(E, heads, kp2)
    q2, k2, v2 = s4_premix_forward(x2, params2, heads,
                                   compute_dtype=jnp.float32, chunk=128)
    jax.block_until_ready((q2, k2, v2))
    q2r, k2r, v2r = reference_forward(x2, params2, heads)
    for got, ref in ((q2, q2r), (k2, k2r), (v2, v2r)):
        np.testing.assert_allclose(np.asarray(got), np.asarray(ref),
                                   rtol=2e-3, atol=2e-3)

    # --- bf16 operand path (f32 accumulation / f32 state), looser tolerance ---
    qb, kb, vb = s4_premix_forward(x2, params2, heads,
                                   compute_dtype=jnp.bfloat16, chunk=128)
    jax.block_until_ready((qb, kb, vb))
    for got, ref in ((qb, q2r), (kb, k2r), (vb, v2r)):
        np.testing.assert_allclose(np.asarray(got, dtype=np.float32),
                                   np.asarray(ref), rtol=1e-1, atol=1e-1)

    print("KERNEL_OK")
</pallas_src>

<mosaic_0001>
module attributes {stable_mosaic.version = 11 : i64} {
  func.func @matmul_kernel(%arg0: i32, %arg1: i32, %arg2: memref<16x32xf32, #tpu.memory_space<vmem>>, %arg3: memref<32x8xf32, #tpu.memory_space<vmem>>, %arg4: memref<16x8xf32, #tpu.memory_space<vmem>>) attributes {dimension_semantics = [#tpu.dimension_semantics<parallel>, #tpu.dimension_semantics<parallel>], iteration_bounds = array<i64: 1, 1>, scalar_prefetch = 0 : i64, scratch_operands = 0 : i64, tpu.core_type = #tpu.core_type<tc>, window_params = [{transform_indices = @transform_0, window_bounds = array<i64: 16, 32>}, {transform_indices = @transform_1, window_bounds = array<i64: 32, 8>}, {transform_indices = @transform_2, window_bounds = array<i64: 16, 8>}]} {
    %c0 = arith.constant 0 : index
    %c0_0 = arith.constant 0 : index
    %0 = vector.load %arg2[%c0, %c0_0] : memref<16x32xf32, #tpu.memory_space<vmem>>, vector<16x32xf32>
    %c0_1 = arith.constant 0 : index
    %c0_2 = arith.constant 0 : index
    %1 = vector.load %arg3[%c0_1, %c0_2] : memref<32x8xf32, #tpu.memory_space<vmem>>, vector<32x8xf32>
    %cst = arith.constant dense<0.000000e+00> : vector<16x8xf32>
    %2 = tpu.matmul %0, %1, %cst {dimension_numbers = #tpu.dot_dimension_numbers<[1], [0], [0], [1], [0, 0, 1, 1], [], []>} : vector<16x32xf32>, vector<32x8xf32>, vector<16x8xf32> -> vector<16x8xf32>
    %c0_3 = arith.constant 0 : index
    %c0_4 = arith.constant 0 : index
    %3 = vector.load %arg4[%c0_3, %c0_4] : memref<16x8xf32, #tpu.memory_space<vmem>>, vector<16x8xf32>
    tpu.vector_store %arg4[%c0_3, %c0_4], %2 {strides = array<i32>} : memref<16x8xf32, #tpu.memory_space<vmem>>, vector<16x8xf32>,
    return
  }
  func.func @transform_0(%arg0: i32, %arg1: i32) -> (i32, i32) {
    %c0_i32 = arith.constant 0 : i32
    %c0_i32_0 = arith.constant 0 : i32
    return %arg0, %c0_i32 : i32, i32
  }
  func.func @transform_1(%arg0: i32, %arg1: i32) -> (i32, i32) {
    %c0_i32 = arith.constant 0 : i32
    %c0_i32_0 = arith.constant 0 : i32
    return %c0_i32, %arg1 : i32, i32
  }
  func.func @transform_2(%arg0: i32, %arg1: i32) -> (i32, i32) {
    %c0_i32 = arith.constant 0 : i32
    return %arg0, %arg1 : i32, i32
  }
}

</mosaic_0001>

<bundles_post_ra>
// kernel: tpu_custom_call.1
= control target key start
LH: loop header
LB: loop body
LE: loop exit
PB: predicated region body
PF: predicated region fallthrough
CT: control target
= control target key end

     0   :  { %vm17_vm0 = vcmask 261120   ;;  %vm47_vm1 = vcmask 64512   ;;  %s99_s1 = inlined_call_operand.vmem [shape: f32[32,8], index: 1, kind: input, shape index: {}]   ;;  %s100_s0 = inlined_call_operand.vmem [shape: f32[16,32], index: 0, kind: input, shape index: {}]   ;;  %s101_s2 = inlined_call_operand.vmem [shape: f32[16,8], index: 2, kind: output, shape index: {}]  }
   0x1   :  { %v16_v0 = vld [vmem:[%s99_s1 + $0x18] sm:$0xff]  ;;  %v15_v1 = vld [vmem:[%s99_s1 + $0x10] sm:$0xff]  ;;  %v14_v2 = vld [vmem:[%s99_s1 + $0x8] sm:$0xff] }
   0x2   :  { %36 = vmatpush.msra.mxu0 %v16_v0  ;;  %56 = vmatpush.msra.mxu1 %v16_v0  ;;  %v13_v3 = vld [vmem:[%s99_s1] sm:$0xff]  ;;  %v12_v5 = vld [vmem:[%s100_s0 + $0x8] sm:$0xff] }
   0x3   :  { %v11_v4 = vld [vmem:[%s100_s0] sm:$0xff] }
   0x4   :  { %37 = vmatpush.msra.mxu0 %v15_v1  ;;  %57 = vmatpush.msra.mxu1 %v15_v1 }
   0x6   :  { %38 = vmatpush.msra.mxu0 %v14_v2  ;;  %58 = vmatpush.msra.mxu1 %v14_v2 }
   0x8   :  { %39 = vmatpush.msra.mxu0 %v13_v3  ;;  %59 = vmatpush.msra.mxu1 %v13_v3 }
   0x9   :  { %54 = vmatmul.msk.f32.vlgmr.msra.gmra.mxu0 %vm17_vm0, %v11_v4  ;;  %55 = vmatmul.msk.f32.vlgmr.msra.gmra.mxu1 %vm17_vm0, %v12_v5 }
  0x86   :  { %v41_v6 = vpop.f32.mrf.mxu0  ;;  %v44_v7 = vpop.f32.mrf.mxu1 }
  0x87   :  { %48 = vst.msk [vmem:[%s101_s2] sm:$0xff] %vm47_vm1, %v41_v6 }
  0x88   :  { %49 = vst.msk [vmem:[%s101_s2 + $0x8] sm:$0xff] %vm47_vm1, %v44_v7 }

</bundles_post_ra>
